<compile_context>
chip_gen: v5e
topology: v5e:2x2
jax: 0.10.0
libtpu: 0.0.40
codegen_flags: <defaults>
</compile_context>

<pallas_src>
import functools

import jax
import jax.numpy as jnp
import numpy as np
from jax.experimental import pallas as pl
from jax.experimental.pallas import tpu as pltpu


def _cdiv(a, b):
    return -(-a // b)


def _resblock_kernel(x_ref, w1_ref, w2_ref, *rest, use_conv4):
    """Channel-major refs: x (C_in, TM), weights (C_out, C_in), BN params (C, 1)."""
    if use_conv4:
        w4_ref, s1_ref, b1_ref, t2_ref, o_ref = rest
    else:
        s1_ref, b1_ref, t2_ref, o_ref = rest

    mm_dtype = w1_ref.dtype  # matmul operand dtype (bf16 or f32)

    # bn1 (folded scale/shift) + relu — elementwise math in f32 (v5e-safe).
    x_f32 = x_ref[...].astype(jnp.float32)
    out1 = jnp.maximum(x_f32 * s1_ref[...] + b1_ref[...], 0.0)     # (C_in, TM)
    out1_mm = out1.astype(mm_dtype)

    # conv1 (bn2's per-channel scale already folded into w1 rows) -> +shift2 -> relu
    z = jnp.dot(w1_ref[...], out1_mm, preferred_element_type=jnp.float32)  # (C_mid, TM)
    z = jnp.maximum(z + t2_ref[...], 0.0)

    # conv2
    z = jnp.dot(w2_ref[...], z.astype(mm_dtype),
                preferred_element_type=jnp.float32)                        # (C_out, TM)

    # residual path
    if use_conv4:
        residual = jnp.dot(w4_ref[...], out1_mm, preferred_element_type=jnp.float32)
    else:
        residual = x_f32

    o_ref[...] = (z + residual).astype(o_ref.dtype)


def _choose_tm(m, c_in, c_out, w_itemsize, x_itemsize,
               tm_max=2048, vmem_tile_budget=12 * 1024 * 1024):
    """Pick the M-tile: as large as the VMEM budget allows, multiple of 256,
    capped so the grid keeps >= 2 steps (v7x has 2 TensorCores)."""
    per_m = 2 * (c_in * x_itemsize + c_out * x_itemsize)   # double-buffered x/out tiles
    tm = min(tm_max, vmem_tile_budget // max(per_m, 1))
    tm = min(tm, max(256, _cdiv(m, 2)))
    tm = max(256, (tm // 256) * 256)
    return int(tm)


def residual_block_forward(x_nchw, params, *, stride=1, tm=None):
    """x_nchw: (N, C_in, H, W).  Returns (N, C_out, H, W).  Eval-mode BatchNorm."""
    (w1, w2, w4, g1, b1, m1, v1, g2, b2, m2, v2, eps) = params

    n, c_in, h, w = x_nchw.shape
    c_mid = w1.shape[0]                       # conv1 output channels
    assert w1.shape[1] == c_in
    assert w2.shape[1] == c_mid, "conv2 input channels must match conv1 output"
    c_out = w2.shape[0]
    # Same rule as the PyTorch module: conv4 residual iff channels differ or stride != 1.
    use_conv4 = (c_in != c_mid) or (stride != 1)
    if use_conv4:
        assert w4.shape[:2] == (c_out, c_in)
    else:
        assert c_out == c_in, "identity residual needs matching channel counts"

    M = n * h * w
    in_dt = x_nchw.dtype
    w_dt = w1.dtype
    if tm is None:
        tm = _choose_tm(M, c_in, c_out,
                        jnp.dtype(w_dt).itemsize, jnp.dtype(in_dt).itemsize)
    m_pad = _cdiv(M, tm) * tm

    # NCHW -> channel-major (C_in, M): pixels on the lane axis (lane-dense).
    x2d = jnp.transpose(x_nchw, (1, 0, 2, 3)).reshape(c_in, M)
    if m_pad != M:
        x2d = jnp.pad(x2d, ((0, 0), (0, m_pad - M)))

    f32 = jnp.float32
    # Fold BatchNorm (eval mode) into per-channel scale/shift, shaped (C, 1).
    inv1 = 1.0 / jnp.sqrt(v1.astype(f32) + eps)
    s1 = (g1.astype(f32) * inv1).reshape(c_in, 1)
    sh1 = (b1.astype(f32) - m1.astype(f32) * g1.astype(f32) * inv1).reshape(c_in, 1)
    inv2 = 1.0 / jnp.sqrt(v2.astype(f32) + eps)
    s2 = g2.astype(f32) * inv2                                         # (c_mid,)
    t2 = (b2.astype(f32) - m2.astype(f32) * g2.astype(f32) * inv2).reshape(c_mid, 1)

    # Conv weights (C_out, C_in, 1, 1) -> (C_out, C_in); fold bn2 scale into w1 rows.
    w1m = (w1[:, :, 0, 0].astype(f32) * s2[:, None]).astype(w_dt)
    w2m = w2[:, :, 0, 0].astype(w_dt)

    kernel = functools.partial(_resblock_kernel, use_conv4=use_conv4)

    def full(shape):
        return pl.BlockSpec(shape, lambda i: (0, 0))

    args = [x2d, w1m, w2m]
    in_specs = [
        pl.BlockSpec((c_in, tm), lambda i: (0, i)),   # x tile (lane-dense)
        full((c_mid, c_in)),                          # w1 (bn2 scale folded)
        full((c_out, c_mid)),                         # w2
    ]
    if use_conv4:
        args.append(w4[:, :, 0, 0].astype(w_dt))
        in_specs.append(full((c_out, c_in)))          # w4 only when needed
    args += [s1, sh1, t2]
    in_specs += [full((c_in, 1)), full((c_in, 1)), full((c_mid, 1))]

    out2d = pl.pallas_call(
        kernel,
        out_shape=jax.ShapeDtypeStruct((c_out, m_pad), in_dt),
        grid_spec=pltpu.PrefetchScalarGridSpec(
            num_scalar_prefetch=0,
            grid=(m_pad // tm,),
            in_specs=in_specs,
            out_specs=pl.BlockSpec((c_out, tm), lambda i: (0, i)),
        ),
        compiler_params=pltpu.CompilerParams(
            dimension_semantics=("parallel",),
            vmem_limit_bytes=32 * 1024 * 1024),   # fits v7x (64 MiB) and v5e/v6e
    )(*args)

    # (C_out, M) -> NCHW
    out = out2d[:, :M].reshape(c_out, n, h, w)
    return jnp.transpose(out, (1, 0, 2, 3))


def _reference(x_nchw, params, *, stride=1):
    """Pure-JAX f32 reference (eval-mode BN), NCHW in/out."""
    (w1, w2, w4, g1, b1, m1, v1, g2, b2, m2, v2, eps) = params
    f32 = jnp.float32
    x = x_nchw.astype(f32)
    c_in, c_mid = w1.shape[1], w1.shape[0]
    use_conv4 = (c_in != c_mid) or (stride != 1)

    def bn(t, g, b, m, v):
        g, b, m, v = (u.astype(f32).reshape(1, -1, 1, 1) for u in (g, b, m, v))
        return g * (t - m) / jnp.sqrt(v + eps) + b

    def conv1x1(t, wgt):
        return jnp.einsum("nchw,oc->nohw", t, wgt[:, :, 0, 0].astype(f32))

    out1 = jax.nn.relu(bn(x, g1, b1, m1, v1))
    out = conv1x1(out1, w1)
    out = jax.nn.relu(bn(out, g2, b2, m2, v2))
    out = conv1x1(out, w2)
    residual = conv1x1(out1, w4) if use_conv4 else x
    return out + residual


if __name__ == "__main__":
    # The module's bn2/conv2 dimensions require input_channels == output_channels.
    N, C, H, W = 2, 32, 16, 16          # M = N*H*W = 512 -> tm=256, grid=2
    STRIDE = 1
    EPS = 1e-5

    key = jax.random.PRNGKey(0)
    ks = jax.random.split(key, 12)

    # bf16 storage for activations/weights (half HBM traffic, 2x MXU on v6e/v7x);
    # all BN math and matmul accumulation stay in f32 inside the kernel.
    bf16 = jnp.bfloat16
    x = jax.random.normal(ks[0], (N, C, H, W), dtype=jnp.float32).astype(bf16)

    w1 = (0.1 * jax.random.normal(ks[1], (C, C, 1, 1), dtype=jnp.float32)).astype(bf16)
    w2 = (0.1 * jax.random.normal(ks[2], (C, C, 1, 1), dtype=jnp.float32)).astype(bf16)
    w4 = (0.1 * jax.random.normal(ks[3], (C, C, 1, 1), dtype=jnp.float32)).astype(bf16)

    g1 = 1.0 + 0.1 * jax.random.normal(ks[4], (C,), dtype=jnp.float32)
    b1 = 0.1 * jax.random.normal(ks[5], (C,), dtype=jnp.float32)
    m1 = 0.1 * jax.random.normal(ks[6], (C,), dtype=jnp.float32)
    v1 = jnp.abs(jax.random.normal(ks[7], (C,), dtype=jnp.float32)) + 0.5

    g2 = 1.0 + 0.1 * jax.random.normal(ks[8], (C,), dtype=jnp.float32)
    b2 = 0.1 * jax.random.normal(ks[9], (C,), dtype=jnp.float32)
    m2 = 0.1 * jax.random.normal(ks[10], (C,), dtype=jnp.float32)
    v2 = jnp.abs(jax.random.normal(ks[11], (C,), dtype=jnp.float32)) + 0.5

    params = (w1, w2, w4, g1, b1, m1, v1, g2, b2, m2, v2, EPS)

    out = residual_block_forward(x, params, stride=STRIDE)
    out = jax.block_until_ready(out)

    ref = jax.block_until_ready(_reference(x, params, stride=STRIDE))
    np.testing.assert_allclose(np.asarray(out, dtype=np.float32),
                               np.asarray(ref, dtype=np.float32),
                               rtol=5e-2, atol=5e-2)
    print("KERNEL_OK")
</pallas_src>

<mosaic_0001>
module attributes {stable_mosaic.version = 11 : i64} {
  func.func @_resblock_kernel(%arg0: i32, %arg1: memref<32x256xbf16, #tpu.memory_space<vmem>>, %arg2: memref<32x32xbf16, #tpu.memory_space<vmem>>, %arg3: memref<32x32xbf16, #tpu.memory_space<vmem>>, %arg4: memref<32x1xf32, #tpu.memory_space<vmem>>, %arg5: memref<32x1xf32, #tpu.memory_space<vmem>>, %arg6: memref<32x1xf32, #tpu.memory_space<vmem>>, %arg7: memref<32x256xbf16, #tpu.memory_space<vmem>>) attributes {dimension_semantics = [#tpu.dimension_semantics<parallel>], iteration_bounds = array<i64: 2>, scalar_prefetch = 0 : i64, scratch_operands = 0 : i64, tpu.core_type = #tpu.core_type<tc>, window_params = [{transform_indices = @transform_0, window_bounds = array<i64: 32, 256>}, {pipeline_mode = #tpu.pipeline_mode<synchronous>, transform_indices = @transform_1, window_bounds = array<i64: 32, 32>}, {pipeline_mode = #tpu.pipeline_mode<synchronous>, transform_indices = @transform_2, window_bounds = array<i64: 32, 32>}, {pipeline_mode = #tpu.pipeline_mode<synchronous>, transform_indices = @transform_3, window_bounds = array<i64: 32, 1>}, {pipeline_mode = #tpu.pipeline_mode<synchronous>, transform_indices = @transform_4, window_bounds = array<i64: 32, 1>}, {pipeline_mode = #tpu.pipeline_mode<synchronous>, transform_indices = @transform_5, window_bounds = array<i64: 32, 1>}, {transform_indices = @transform_6, window_bounds = array<i64: 32, 256>}]} {
    %c0 = arith.constant 0 : index
    %c0_0 = arith.constant 0 : index
    %0 = vector.load %arg1[%c0, %c0_0] : memref<32x256xbf16, #tpu.memory_space<vmem>>, vector<32x256xbf16>
    %1 = arith.extf %0 : vector<32x256xbf16> to vector<32x256xf32>
    %c0_1 = arith.constant 0 : index
    %c0_2 = arith.constant 0 : index
    %2 = vector.load %arg4[%c0_1, %c0_2] : memref<32x1xf32, #tpu.memory_space<vmem>>, vector<32x1xf32>
    %3 = vector.broadcast %2 : vector<32x1xf32> to vector<32x256xf32>
    %4 = arith.mulf %1, %3 : vector<32x256xf32>
    %c0_3 = arith.constant 0 : index
    %c0_4 = arith.constant 0 : index
    %5 = vector.load %arg5[%c0_3, %c0_4] : memref<32x1xf32, #tpu.memory_space<vmem>>, vector<32x1xf32>
    %6 = vector.broadcast %5 : vector<32x1xf32> to vector<32x256xf32>
    %7 = arith.addf %4, %6 : vector<32x256xf32>
    %cst = arith.constant 0.000000e+00 : f32
    %8 = vector.broadcast %cst : f32 to vector<32x256xf32>
    %9 = arith.maximumf %7, %8 : vector<32x256xf32>
    %10 = arith.truncf %9 : vector<32x256xf32> to vector<32x256xbf16>
    %c0_5 = arith.constant 0 : index
    %c0_6 = arith.constant 0 : index
    %11 = vector.load %arg2[%c0_5, %c0_6] : memref<32x32xbf16, #tpu.memory_space<vmem>>, vector<32x32xbf16>
    %cst_7 = arith.constant dense<0.000000e+00> : vector<32x256xf32>
    %12 = tpu.matmul %11, %10, %cst_7 {dimension_numbers = #tpu.dot_dimension_numbers<[1], [0], [0], [1], [0, 0, 1, 1], [], []>} : vector<32x32xbf16>, vector<32x256xbf16>, vector<32x256xf32> -> vector<32x256xf32>
    %c0_8 = arith.constant 0 : index
    %c0_9 = arith.constant 0 : index
    %13 = vector.load %arg6[%c0_8, %c0_9] : memref<32x1xf32, #tpu.memory_space<vmem>>, vector<32x1xf32>
    %14 = vector.broadcast %13 : vector<32x1xf32> to vector<32x256xf32>
    %15 = arith.addf %12, %14 : vector<32x256xf32>
    %cst_10 = arith.constant 0.000000e+00 : f32
    %16 = vector.broadcast %cst_10 : f32 to vector<32x256xf32>
    %17 = arith.maximumf %15, %16 : vector<32x256xf32>
    %c0_11 = arith.constant 0 : index
    %c0_12 = arith.constant 0 : index
    %18 = vector.load %arg3[%c0_11, %c0_12] : memref<32x32xbf16, #tpu.memory_space<vmem>>, vector<32x32xbf16>
    %19 = arith.truncf %17 : vector<32x256xf32> to vector<32x256xbf16>
    %cst_13 = arith.constant dense<0.000000e+00> : vector<32x256xf32>
    %20 = tpu.matmul %18, %19, %cst_13 {dimension_numbers = #tpu.dot_dimension_numbers<[1], [0], [0], [1], [0, 0, 1, 1], [], []>} : vector<32x32xbf16>, vector<32x256xbf16>, vector<32x256xf32> -> vector<32x256xf32>
    %21 = arith.addf %20, %1 : vector<32x256xf32>
    %22 = arith.truncf %21 : vector<32x256xf32> to vector<32x256xbf16>
    %c0_14 = arith.constant 0 : index
    %c0_15 = arith.constant 0 : index
    %23 = vector.load %arg7[%c0_14, %c0_15] : memref<32x256xbf16, #tpu.memory_space<vmem>>, vector<32x256xbf16>
    tpu.vector_store %arg7[%c0_14, %c0_15], %22 {strides = array<i32>} : memref<32x256xbf16, #tpu.memory_space<vmem>>, vector<32x256xbf16>,
    return
  }
  func.func @transform_0(%arg0: i32) -> (i32, i32) {
    %c0_i32 = arith.constant 0 : i32
    %c0_i32_0 = arith.constant 0 : i32
    return %c0_i32, %arg0 : i32, i32
  }
  func.func @transform_1(%arg0: i32) -> (i32, i32) {
    %c0_i32 = arith.constant 0 : i32
    %c0_i32_0 = arith.constant 0 : i32
    %c0_i32_1 = arith.constant 0 : i32
    return %c0_i32, %c0_i32_0 : i32, i32
  }
  func.func @transform_2(%arg0: i32) -> (i32, i32) {
    %c0_i32 = arith.constant 0 : i32
    %c0_i32_0 = arith.constant 0 : i32
    %c0_i32_1 = arith.constant 0 : i32
    return %c0_i32, %c0_i32_0 : i32, i32
  }
  func.func @transform_3(%arg0: i32) -> (i32, i32) {
    %c0_i32 = arith.constant 0 : i32
    %c0_i32_0 = arith.constant 0 : i32
    %c0_i32_1 = arith.constant 0 : i32
    return %c0_i32, %c0_i32_0 : i32, i32
  }
  func.func @transform_4(%arg0: i32) -> (i32, i32) {
    %c0_i32 = arith.constant 0 : i32
    %c0_i32_0 = arith.constant 0 : i32
    %c0_i32_1 = arith.constant 0 : i32
    return %c0_i32, %c0_i32_0 : i32, i32
  }
  func.func @transform_5(%arg0: i32) -> (i32, i32) {
    %c0_i32 = arith.constant 0 : i32
    %c0_i32_0 = arith.constant 0 : i32
    %c0_i32_1 = arith.constant 0 : i32
    return %c0_i32, %c0_i32_0 : i32, i32
  }
  func.func @transform_6(%arg0: i32) -> (i32, i32) {
    %c0_i32 = arith.constant 0 : i32
    %c0_i32_0 = arith.constant 0 : i32
    return %c0_i32, %arg0 : i32, i32
  }
}

</mosaic_0001>

<bundles_post_ra>
// kernel: tpu_custom_call.1
= control target key start
LH: loop header
LB: loop body
LE: loop exit
PB: predicated region body
PF: predicated region fallthrough
CT: control target
= control target key end

     0   :  { %11 = vsyncpa [#allocation4], 0  ;;  %s1032_s0 = inlined_call_operand.vmem [shape: bf16[32,512], index: 0, kind: input, shape index: {}]   ;;  %s1033_s1 = inlined_call_operand.vmem [shape: bf16[32,32], index: 1, kind: input, shape index: {}]   ;;  %s1034_s2 = inlined_call_operand.vmem [shape: bf16[32,32], index: 2, kind: input, shape index: {}]   ;;  %s1035_s3 = inlined_call_operand.vmem [shape: f32[32,1], index: 3, kind: input, shape index: {}]   ;;  %s1036_s4 = inlined_call_operand.vmem [shape: f32[32,1], index: 4, kind: input, shape index: {}]   ;;  %s1037_s5 = inlined_call_operand.vmem [shape: f32[32,1], index: 5, kind: input, shape index: {}]   ;;  %s1038_s6 = inlined_call_operand.hbm [shape: bf16[32,512], index: 6, kind: output, shape index: {}]  }
   0x1   :  { %13 = vsyncpa [#allocation4 + $0x1], 0  ;;  %s827_s21 = smov 0   ;;  %s829_s22 = smov 0  }
   0x2   :  { %s831_s23 = smov 0   ;;  %s833_s24 = smov 0  }
   0x3 LB: > { %s633_s25 = sadd.s32 4294967295, %s786_s24   ;;  %s634_s26 = sadd.s32 4294967294, %s786_s24   ;;  %s786_s24 = sphi %s833_s24, %s1044_s24   ;;  %s782_s23 = sphi %s831_s23, %s1043_s23   ;;  %s778_s22 = sphi %s829_s22, %s1042_s22   ;;  %s774_s21 = sphi %s827_s21, %s1041_s21  }
   0x4   : > { %s850_s27 = sadd.s32 1, %s786_s24   ;;  %s26_s28 = sadd.s32 1, %s782_s23 }
   0x5   : > { %s23_s29 = ssub.s32 %s786_s24, %s850_s27  ;;  %p33_p0 = scmp.ne.s32.totalorder %s782_s23, %s778_s22 }
   0x6   : > { %p24_p1 = scmp.eq.s32.totalorder %s23_s29, 0  ;;  %p34_p2 = scmp.eq.s32.totalorder %s786_s24, 0 }
   0x7   : > { %p168_p3 = scmp.eq.s32.totalorder %s633_s25, 1  ;;  %p173_p4 = scmp.ne.s32.totalorder %s778_s22, %s774_s21 }
   0x8   : > { %s863_s30 = scalar_select %p24_p1, %s782_s23, %s26_s28  }
   0x9   : > { %p35_p5 = por %p34_p2, %p33_p0  ;;  %p865_p6 = por %p168_p3, %p33_p0 }
   0xa   : > { %p174_p7 = scmp.eq.s32.totalorder %s634_s26, 1  ;;  %p636_p9 = scmp.ge.s32.totalorder %s786_s24, 2 }
   0xc   : > { %p869_p8 = por %p174_p7, %p173_p4  ;;  %205 = sbr.rel (%p636_p9) target bundleno = 25 (0x19), region = 36 }
  0x11   : > { %208 = sbr.rel (!%p35_p5) target bundleno = 25 (0x19), region = 40  ;;  %s210_s9 = sand.u32 (%p35_p5), 1, %s782_s23  }
  0x12   : > { %s672_s10 = sshll.u32 (%p35_p5), %s786_s24, 3  ;;  %s637_s11 = sshll.u32 (%p35_p5), %s210_s9, 5 }
  0x13   : > { %s215_s14 = scalar_lea.vmem (%p35_p5), %s1032_s0, %s672_s10  ;;  %s212_s15 = scalar_lea.vmem (%p35_p5), [#allocation2], %s637_s11 }
  0x14   : > { %v250_v0 = vld [vmem:[%s215_s14] sm:$0xff] (%p35_p5)  ;;  %v252_v1 = vld [vmem:[%s215_s14 + $0x10] sm:$0xff] (%p35_p5) }
  0x15   : > { %v254_v2 = vld [vmem:[%s215_s14 + $0x20] sm:$0xff] (%p35_p5)  ;;  %251 = vst [vmem:[%s212_s15] sm:$0xff] (%p35_p5), %v250_v0  ;;  %v256_v3 = vld [vmem:[%s215_s14 + $0x30] sm:$0xff] (%p35_p5) }
  0x16   : > { %253 = vst [vmem:[%s212_s15 + $0x8] sm:$0xff] %v252_v1 }
  0x17   : > { %255 = vst [vmem:[%s212_s15 + $0x10] sm:$0xff] %v254_v2 }
  0x18   : > { %257 = vst [vmem:[%s212_s15 + $0x18] sm:$0xff] %v256_v3 }
  0x19 PF: > { %p640_p10 = scmp.ge.s32.totalorder %s786_s24, 1  ;;  %p262_p11 = scmp.lt.s32.totalorder %s786_s24, 3 }
  0x1b   : > { %p263_p12 = pnand %p640_p10, %p262_p11 }
  0x1c   : > { %s269_s10 = sand.u32 (!%p263_p12), 1, %s778_s22   ;;  %s677_s28 = sshll.u32 (!%p263_p12), %s633_s25, 3 }
  0x1d   : > { %266 = sbr.rel (%p263_p12) target bundleno = 504 (0x1f8), region = 78  ;;  %s922_s11 = sshll.u32 (!%p263_p12), %s269_s10, 5 }
  0x1e   : > { %s271_s12 = scalar_lea.vmem (!%p263_p12), [#allocation2], %s922_s11  ;;  %s297_s26 = scalar_lea.vmem (!%p263_p12), [#allocation3], %s922_s11 }
  0x1f   : > { %s562_s11 = scalar_lea.hbm (!%p263_p12), %s1038_s6, %s677_s28  ;;  %s551_s25 = scalar_lea.sflag (!%p263_p12), [#allocation4], %s269_s10 }
  0x20   : > { %s995_s13 = sshll.u32 (!%p263_p12), %s562_s11, 4  ;;  %s744_s18 = scalar_lea.hbm (!%p263_p12), %s1038_s6, 64  ;;  %s566_s13 = int_to_ptr.hbm [resolvable:$true] %s995_s13 }
  0x21   : > { %s738_s14 = sshra.s32 (!%p263_p12), %s566_s13, 4  ;;  %s739_s14 = int_to_ptr.hbm [resolvable:$true] %s738_s14 }
  0x22   : > { %v347_v4 = vld [vmem:[%s1036_s4 + $0x10] sm:$0xff]  ;;  %v788_v6 = vmov 0   ;;  %v313_v7 = vld [vmem:[%s1035_s3] sm:$0xff]  ;;  %v348_v8 = vld [vmem:[%s1036_s4 + $0x18] sm:$0xff]  ;;  %vm427_vm0 = vcmask 261120   ;;  %s740_s15 = scalar_lea.hbm %s739_s14, 32  ;;  %p745_p2 = scmp.lt.s32.totalorder %s739_s14, %s1038_s6 }
  0x23   : > { %v315_v5 = vld [vmem:[%s1035_s3 + $0x10] sm:$0xff]  ;;  %722 = vset.pattern.permute.xlu1 %v788_v6  ;;  %721 = vset.pattern.permute.xlu0 %v788_v6  ;;  %v316_v9 = vld [vmem:[%s1035_s3 + $0x18] sm:$0xff]  ;;  %v314_v10 = vld [vmem:[%s1035_s3 + $0x8] sm:$0xff]  ;;  %p741_p13 = scmp.ne.s32.totalorder %s739_s14, %s740_s15  ;;  %p746_p3 = scmp.lt.s32.totalorder %s744_s18, %s740_s15 }
  0x24   : > { %361 = vperm.xlu1 %722, %v347_v4   ;;  %329 = vperm.xlu0 %721, %v315_v5   ;;  %v346_v11 = vld [vmem:[%s1036_s4 + $0x8] sm:$0xff]  ;;  %v345_v12 = vld [vmem:[%s1036_s4] sm:$0xff]  ;;  %v395_v13 = vld [vmem:[%s1037_s5 + $0x10] sm:$0xff] }
  0x25   : > { %723 = vset.pattern.permute.xlu2 %v788_v6  ;;  %v393_v14 = vld [vmem:[%s1037_s5] sm:$0xff]  ;;  %v396_v15 = vld [vmem:[%s1037_s5 + $0x18] sm:$0xff]  ;;  %v394_v16 = vld [vmem:[%s1037_s5 + $0x8] sm:$0xff]  ;;  %p742_p0 = pnand %p741_p13, %p865_p6  ;;  %p747_p4 = por %p746_p3, %p745_p2 }
  0x26   : > { %319 = vperm.xlu2 %723, %v313_v7   ;;  %v925_v17 = vld [vmem:[%s271_s12 + $0x10] sm:$0xff]  ;;  %v929_v22 = vld [vmem:[%s271_s12 + $0x18] sm:$0xff]  ;;  %v937_v28 = vld [vmem:[%s271_s12] sm:$0xff] }
  0x27   : > { %v309_v20 = vunpack.c.l.bf16 %v925_v17  ;;  %v310_v21 = vunpack.c.h.bf16 %v925_v17  ;;  %v311_v26 = vunpack.c.l.bf16 %v929_v22  ;;  %v312_v27 = vunpack.c.h.bf16 %v929_v22  ;;  %v939_v29 = vld [vmem:[%s271_s12 + $0x8] sm:$0xff]  ;;  %v673_v1 = vld [vmem:[%s1033_s1] sm:$0xff]  ;;  %s563_s12 = sshll.u32 %s297_s26, 4  ;;  %p743_p1 = pneg %p742_p0  ;;  %s564_s12 = int_to_ptr.vmem [resolvable:$true] %s563_s12 }
  0x28   : > { %v305_v36 = vunpack.c.l.bf16 %v937_v28  ;;  %v306_v37 = vunpack.c.h.bf16 %v937_v28  ;;  %v307_v38 = vunpack.c.l.bf16 %v939_v29  ;;  %v308_v39 = vunpack.c.h.bf16 %v939_v29  ;;  %v674_v2 = vld [vmem:[%s1033_s1 + $0x8] sm:$0xff] }
  0x29   : > { %p748_p5 = pnand %p747_p4, %p743_p1 }
  0x2c   : > { %366 = vperm.xlu1 %722, %v348_v8   ;;  %334 = vperm.xlu0 %721, %v316_v9  }
  0x2e   : > { %324 = vperm.xlu2 %723, %v314_v10  }
  0x34   : > { %356 = vperm.xlu1 %722, %v346_v11   ;;  %351 = vperm.xlu0 %721, %v345_v12  }
  0x36   : > { %409 = vperm.xlu2 %723, %v395_v13  }
  0x3c   : > { %399 = vperm.xlu1 %722, %v393_v14   ;;  %414 = vperm.xlu0 %721, %v396_v15  }
  0x3e   : > { %404 = vperm.xlu2 %723, %v394_v16  }
  0x80   : > { %v320_v23 = vpop.permute.xlu2 %319 }
  0x81   : > { %v337_v46 = vmul.f32 %v320_v23, %v305_v36  ;;  %v338_v47 = vmul.f32 %v320_v23, %v306_v37 }
  0x88   : > { %v325_v48 = vpop.permute.xlu2 %324 }
  0x89   : > { %v339_v49 = vmul.f32 %v325_v48, %v307_v38  ;;  %v340_v50 = vmul.f32 %v325_v48, %v308_v39  ;;  %v676_v48 = vld [vmem:[%s1034_s2 + $0x8] sm:$0xff] }
  0x90   : > { %v410_v7 = vpop.permute.xlu2 %409 }
  0x96   : > { %v362_v18 = vpop.permute.xlu1 %361  ;;  %v330_v19 = vpop.permute.xlu0 %329 }
  0x97   : > { %v341_v24 = vmul.f32 %v330_v19, %v309_v20  ;;  %v342_v25 = vmul.f32 %v330_v19, %v310_v21 }
  0x98   : > { %v405_v10 = vpop.permute.xlu2 %404 }
  0x99   : > { %v373_v34 = vadd.f32 %v362_v18, %v341_v24  ;;  %v374_v35 = vadd.f32 %v362_v18, %v342_v25 }
  0x9b   : > { %v381_v42 = vmax.f32 %v373_v34, 0.0  ;;  %v382_v44 = vmax.f32 %v374_v35, 0.0 }
  0x9e   : > { %v367_v30 = vpop.permute.xlu1 %366  ;;  %v335_v31 = vpop.permute.xlu0 %334 }
  0x9f   : > { %v343_v32 = vmul.f32 %v335_v31, %v311_v26  ;;  %v344_v33 = vmul.f32 %v335_v31, %v312_v27 }
  0xa1   : > { %v375_v40 = vadd.f32 %v367_v30, %v343_v32  ;;  %v376_v41 = vadd.f32 %v367_v30, %v344_v33 }
  0xa3   : > { %v383_v43 = vmax.f32 %v375_v40, 0.0  ;;  %v384_v45 = vmax.f32 %v376_v41, 0.0 }
  0xa5   : > { %v387_v51 = vpack.c.bf16 %v383_v43, %v381_v42  ;;  %v388_v52 = vpack.c.bf16 %v384_v45, %v382_v44 }
  0xa6   : > { %v357_v53 = vpop.permute.xlu1 %356  ;;  %v352_v54 = vpop.permute.xlu0 %351 }
  0xa7   : > { %v371_v55 = vadd.f32 %v357_v53, %v339_v49  ;;  %v372_v56 = vadd.f32 %v357_v53, %v340_v50  ;;  %v369_v57 = vadd.f32 %v352_v54, %v337_v46  ;;  %v370_v58 = vadd.f32 %v352_v54, %v338_v47  ;;  %440 = vmatpush.bf16.msra.mxu0 %v387_v51  ;;  %v675_v47 = vld [vmem:[%s1034_s2] sm:$0xff] }
  0xa8   : > { %459 = vmatpush.bf16.msra.mxu1 %v388_v52 }
  0xa9   : > { %v379_v59 = vmax.f32 %v371_v55, 0.0  ;;  %v380_v60 = vmax.f32 %v372_v56, 0.0  ;;  %v377_v61 = vmax.f32 %v369_v57, 0.0  ;;  %v378_v62 = vmax.f32 %v370_v58, 0.0 }
  0xab   : > { %v385_v63 = vpack.c.bf16 %v379_v59, %v377_v61  ;;  %v386_v0 = vpack.c.bf16 %v380_v60, %v378_v62 }
  0xad   : > { %441 = vmatpush.bf16.msra.mxu0 %v385_v63  ;;  %460 = vmatpush.bf16.msra.mxu1 %v386_v0 }
  0xae   : > { %v415_v11 = vpop.permute.xlu0 %414  ;;  %v400_v16 = vpop.permute.xlu1 %399 }
  0xb0   : > { %651 = vmatmul.msk.bf16.vlgmr.msra.gmra.mxu0 %vm427_vm0, %v673_v1  ;;  %653 = vmatmul.msk.bf16.vlgmr.msra.gmra.mxu1 %vm427_vm0, %v673_v1 }
  0xc0   : > { %652 = vmatmul.msk.bf16.gmra.mxu0 %vm427_vm0, %v674_v2  ;;  %654 = vmatmul.msk.bf16.gmra.mxu1 %vm427_vm0, %v674_v2 }
 0x12d   : > { %v443_v3 = vpop.f32.mrf.mxu0  ;;  %v462_v4 = vpop.f32.mrf.mxu1 }
 0x12e   : > { %v444_v25 = vadd.f32 %v443_v3, %v400_v16  ;;  %v463_v30 = vadd.f32 %v462_v4, %v400_v16 }
 0x130   : > { %v472_v43 = vmax.f32 %v444_v25, 0.0  ;;  %v473_v44 = vmax.f32 %v463_v30, 0.0 }
 0x135   : > { %v445_v5 = vpop.f32.mrf.mxu0  ;;  %v464_v6 = vpop.f32.mrf.mxu1 }
 0x136   : > { %v446_v18 = vadd.f32 %v445_v5, %v405_v10  ;;  %v465_v19 = vadd.f32 %v464_v6, %v405_v10 }
 0x138   : > { %v474_v35 = vmax.f32 %v446_v18, 0.0  ;;  %v475_v40 = vmax.f32 %v465_v19, 0.0 }
 0x13a   : > { %v484_v45 = vpack.c.bf16 %v474_v35, %v472_v43  ;;  %v485_v46 = vpack.c.bf16 %v475_v40, %v473_v44 }
 0x13d   : > { %v448_v8 = vpop.f32.mrf.mxu0  ;;  %v467_v9 = vpop.f32.mrf.mxu1 }
 0x13e   : > { %v449_v12 = vadd.f32 %v448_v8, %v410_v7  ;;  %v468_v13 = vadd.f32 %v467_v9, %v410_v7 }
 0x140   : > { %v476_v31 = vmax.f32 %v449_v12, 0.0  ;;  %v477_v32 = vmax.f32 %v468_v13, 0.0 }
 0x145   : > { %v450_v14 = vpop.f32.mrf.mxu0  ;;  %v469_v15 = vpop.f32.mrf.mxu1 }
 0x146   : > { %v451_v23 = vadd.f32 %v450_v14, %v415_v11  ;;  %v470_v24 = vadd.f32 %v469_v15, %v415_v11 }
 0x148   : > { %v478_v33 = vmax.f32 %v451_v23, 0.0  ;;  %v479_v34 = vmax.f32 %v470_v24, 0.0 }
 0x14a   : > { %v486_v41 = vpack.c.bf16 %v478_v33, %v476_v31  ;;  %v487_v42 = vpack.c.bf16 %v479_v34, %v477_v32 }
 0x14c   : > { %510 = vmatpush.bf16.msra.mxu2 %v486_v41  ;;  %529 = vmatpush.bf16.msra.mxu3 %v487_v42 }
 0x150   : > { %511 = vmatpush.bf16.msra.mxu2 %v484_v45  ;;  %530 = vmatpush.bf16.msra.mxu3 %v485_v46 }
 0x153   : > { %663 = vmatmul.msk.bf16.vlgmr.msra.gmra.mxu2 %vm427_vm0, %v675_v47  ;;  %665 = vmatmul.msk.bf16.vlgmr.msra.gmra.mxu3 %vm427_vm0, %v675_v47 }
 0x163   : > { %664 = vmatmul.msk.bf16.gmra.mxu2 %vm427_vm0, %v676_v48  ;;  %666 = vmatmul.msk.bf16.gmra.mxu3 %vm427_vm0, %v676_v48 }
 0x1d6   : > { %v513_v49 = vpop.f32.mrf.mxu2  ;;  %v532_v50 = vpop.f32.mrf.mxu3 }
 0x1d7   : > { %v514_v51 = vadd.f32 %v513_v49, %v305_v36  ;;  %v533_v52 = vadd.f32 %v532_v50, %v306_v37 }
 0x1d9   : > { %v542_v53 = vpack.c.bf16 %v533_v52, %v514_v51 }
 0x1db   : > { %546 = vst [vmem:[%s297_s26] sm:$0xff] %v542_v53 }
 0x1de   : > { %v515_v54 = vpop.f32.mrf.mxu2  ;;  %v534_v55 = vpop.f32.mrf.mxu3 }
 0x1df   : > { %v516_v56 = vadd.f32 %v515_v54, %v307_v38  ;;  %v535_v57 = vadd.f32 %v534_v55, %v308_v39 }
 0x1e1   : > { %v543_v58 = vpack.c.bf16 %v535_v57, %v516_v56 }
 0x1e3   : > { %547 = vst [vmem:[%s297_s26 + $0x8] sm:$0xff] %v543_v58 }
 0x1e6   : > { %v518_v59 = vpop.f32.mrf.mxu2  ;;  %v537_v60 = vpop.f32.mrf.mxu3 }
 0x1e7   : > { %v519_v36 = vadd.f32 %v518_v59, %v309_v20  ;;  %v538_v28 = vadd.f32 %v537_v60, %v310_v21 }
 0x1e9   : > { %v544_v37 = vpack.c.bf16 %v538_v28, %v519_v36 }
 0x1eb   : > { %548 = vst [vmem:[%s297_s26 + $0x10] sm:$0xff] %v544_v37 }
 0x1ee   : > { %v520_v29 = vpop.f32.mrf.mxu2  ;;  %v539_v38 = vpop.f32.mrf.mxu3 }
 0x1ef   : > { %v521_v17 = vadd.f32 %v520_v29, %v311_v26  ;;  %v540_v20 = vadd.f32 %v539_v38, %v312_v27 }
 0x1f1   : > { %v545_v21 = vpack.c.bf16 %v540_v20, %v521_v17 }
 0x1f3   : > { %549 = vst [vmem:[%s297_s26 + $0x18] sm:$0xff] %v545_v21 }
 0x1f4   : > { %751 = shalt.err (!%p748_p5)
}
 0x1f5   : > { %s789_s10 = smov 128   ;;  %s790_s26 = smov 256  }
 0x1f6   : > { %s791_s28 = smov 8  }
 0x1f7   : > { %678 = dma.vmem_to_hbm [thread:$0]  (%p865_p6), %s564_s12, 512, %s566_s13, %s551_s25, %s789_s10, %s790_s26, %s791_s28  }
 0x1f8 PF: > { %s580_s29 = sand.u32 1, %s774_s21   ;;  %p681_p7 = pnand %p636_p9, %p869_p8 }
 0x1f9   : > { %s581_s9 = scalar_lea.sflag [#allocation4], %s580_s29 }
 0x1fa   : > { %p682_p10 = pneg %p681_p7 }
 0x1fc   : > { %769 = dma.done.wait (%p682_p10), %s581_s9, 512  }
 0x1fd   : > { %771 = vsyncadd (%p682_p10), %s581_s9, 4294966784  ;;  %p16_p11 = scmp.ge.s32.totalorder %s850_s27, 4   ;;  %s1041_s21 = smov %s778_s22 }
 0x1fe   : > { %s1042_s22 = smov %s782_s23  ;;  %s1043_s23 = smov %s863_s30 }
 0x1ff   : > { %s1044_s24 = smov %s850_s27  ;;  %18 = sbr.rel (!%p16_p11) target bundleno = 3 (0x3), region = 122 }
 0x204   :  { %587 = vsyncpa [#allocation4], 1 }
 0x205   :  { %589 = vsyncpa [#allocation4 + $0x1], 1 }

</bundles_post_ra>
